<compile_context>
chip_gen: v7x
topology: tpu7x:2x2x1
jax: 0.10.0
libtpu: 0.0.40
codegen_flags: <defaults>
</compile_context>

<pallas_src>
import jax
import jax.numpy as jnp
from jax.experimental import pallas as pl
from jax.experimental.pallas import tpu as pltpu

LANE = 128
BF16_ROWS = 16          # bf16 packs 16 rows per vreg on the sublane axis


def _round_up(x, m):
    return (x + m - 1) // m * m


def _cdiv(a, b):
    return (a + b - 1) // b


def _vmem_capacity_bytes():
    # Per-generation VMEM (v5e/v6e: 128 MiB, v7x per-TC: 64 MiB). Conservative fallback.
    try:
        info = pltpu.get_tpu_info()
        cap = getattr(info, "vmem_capacity_bytes", None)
        if cap:
            return int(cap)
    except Exception:
        pass
    return 64 << 20


def _choose_batch_tiling(B, tm_max):
    """Pick (tm, b_pad, n_tiles) with small padding waste and >=2 grid steps when possible."""
    tm_max = max(BF16_ROWS, min(_round_up(tm_max, BF16_ROWS), _round_up(B, BF16_ROWS)))
    n_tiles = _cdiv(B, tm_max)
    # v7x has 2 TensorCores; give the "parallel" batch axis at least 2 steps whenever
    # each step can still hold >= 16 rows.  (No-op cost on v5e/v6e: 1 extra grid step.)
    if n_tiles == 1 and B > BF16_ROWS:
        n_tiles = 2
    tm = _round_up(_cdiv(B, n_tiles), BF16_ROWS)
    return tm, tm * n_tiles, n_tiles


def sfen_kernel(x_ref, eps_ref,
                w1_ref, b1_ref, wml_ref, bml_ref,
                w2_ref, b2_ref, w3_ref, b3_ref,
                recon_ref, ml_ref):
    lat_pad = eps_ref.shape[1]

    x = x_ref[...]                                              # (TM, IN_PAD) bf16

    # ---- encode: bf16 MXU matmuls, f32 accumulate, f32 elementwise ----
    h = jnp.dot(x, w1_ref[...], preferred_element_type=jnp.float32) + b1_ref[...]
    h = jnp.maximum(h, 0.0)

    # fused mean|logvar projection: single lane-dense (TM, 2*LAT_PAD) MXU result
    ml = jnp.dot(h.astype(wml_ref.dtype), wml_ref[...],
                 preferred_element_type=jnp.float32) + bml_ref[...]
    mean = ml[:, :lat_pad]
    logvar = ml[:, lat_pad:]

    # ---- reparameterize (exp on EUP, rest VPU, all f32) ----
    eps = eps_ref[...].astype(jnp.float32)
    z = mean + eps * jnp.exp(0.5 * logvar)

    # ---- decode ----
    h2 = jnp.dot(z.astype(w2_ref.dtype), w2_ref[...],
                 preferred_element_type=jnp.float32) + b2_ref[...]
    h2 = jnp.maximum(h2, 0.0)
    recon = jnp.dot(h2.astype(w3_ref.dtype), w3_ref[...],
                    preferred_element_type=jnp.float32) + b3_ref[...]

    recon_ref[...] = recon.astype(recon_ref.dtype)
    ml_ref[...] = ml.astype(ml_ref.dtype)


def sfen_forward(x, eps, params, *, tm=512, compute_dtype=jnp.bfloat16):
    """x: [B, input_dim] f32, eps: [B, latent_dim] f32. Returns (recon, mean, logvar) f32."""
    B, input_dim = x.shape
    latent_dim = eps.shape[1]
    hidden_dim = params["w1"].shape[1]

    in_pad = _round_up(input_dim, LANE)
    hid_pad = _round_up(hidden_dim, LANE)
    lat_pad = _round_up(latent_dim, LANE)

    tm, b_pad, n_tiles = _choose_batch_tiling(B, tm)

    def pad_cast(a, r, c, dtype):
        # No-op when already aligned / correct dtype (avoids an extra HBM pass).
        if a.shape != (r, c):
            a = jnp.pad(a, ((0, r - a.shape[0]), (0, c - a.shape[1])))
        if a.dtype != dtype:
            a = a.astype(dtype)
        return a

    # Pad + fuse + cast weights once (zero padding keeps the math exact).
    w1 = pad_cast(params["w1"], in_pad, hid_pad, compute_dtype)
    b1 = pad_cast(params["b1"], 1, hid_pad, jnp.float32)
    wml = jnp.concatenate(
        [pad_cast(params["wm"], hid_pad, lat_pad, compute_dtype),
         pad_cast(params["wl"], hid_pad, lat_pad, compute_dtype)], axis=1)
    bml = jnp.concatenate(
        [pad_cast(params["bm"], 1, lat_pad, jnp.float32),
         pad_cast(params["bl"], 1, lat_pad, jnp.float32)], axis=1)
    w2 = pad_cast(params["w2"], lat_pad, hid_pad, compute_dtype)
    b2 = pad_cast(params["b2"], 1, hid_pad, jnp.float32)
    w3 = pad_cast(params["w3"], hid_pad, in_pad, compute_dtype)
    b3 = pad_cast(params["b3"], 1, in_pad, jnp.float32)

    # Activations: bf16 streams only (x and eps in, recon and mean|logvar out).
    x_p = pad_cast(x, b_pad, in_pad, compute_dtype)
    eps_p = pad_cast(eps, b_pad, lat_pad, compute_dtype)

    grid = (n_tiles,)

    def act_spec(feat):
        return pl.BlockSpec((tm, feat), lambda i: (i, 0))

    def res_spec(shape):
        # Same block every grid step -> stays resident in VMEM (no per-step DMA).
        return pl.BlockSpec(shape, lambda i: (0, 0))

    # ---- VMEM budget -------------------------------------------------------
    bf16_b, f32_b = 2, 4
    weight_bytes = bf16_b * (in_pad * hid_pad + hid_pad * 2 * lat_pad
                             + lat_pad * hid_pad + hid_pad * in_pad)
    bias_bytes = f32_b * (2 * hid_pad + 2 * lat_pad + in_pad)
    # Pallas double-buffers every input, even constant-index_map ones -> count 2x.
    resident_bytes = 2 * (weight_bytes + bias_bytes)
    # Double-buffered activation tiles: x, eps inputs; recon, mean|logvar outputs (bf16).
    stream_bytes = 2 * bf16_b * tm * (in_pad + lat_pad + in_pad + 2 * lat_pad)
    # f32 intermediates (h, ml, z, h2, recon) + bf16 re-casts + slack.
    scratch_bytes = 2 * f32_b * tm * (2 * hid_pad + 3 * lat_pad + in_pad)
    budget = resident_bytes + stream_bytes + scratch_bytes + (4 << 20)
    vmem_limit = int(min(max(budget, 32 << 20), int(0.85 * _vmem_capacity_bytes())))

    recon_p, ml_p = pl.pallas_call(
        sfen_kernel,
        grid=grid,
        out_shape=(
            jax.ShapeDtypeStruct((b_pad, in_pad), compute_dtype),        # recon (padded)
            jax.ShapeDtypeStruct((b_pad, 2 * lat_pad), compute_dtype),   # mean|logvar (padded)
        ),
        in_specs=[
            act_spec(in_pad),                     # x
            act_spec(lat_pad),                    # eps
            res_spec((in_pad, hid_pad)),          # w1
            res_spec((1, hid_pad)),               # b1
            res_spec((hid_pad, 2 * lat_pad)),     # wm|wl fused
            res_spec((1, 2 * lat_pad)),           # bm|bl fused
            res_spec((lat_pad, hid_pad)),         # w2
            res_spec((1, hid_pad)),               # b2
            res_spec((hid_pad, in_pad)),          # w3
            res_spec((1, in_pad)),                # b3
        ],
        out_specs=(act_spec(in_pad), act_spec(2 * lat_pad)),
        compiler_params=pltpu.CompilerParams(
            dimension_semantics=("parallel",),    # shard batch grid across v7x's 2 TCs
            vmem_limit_bytes=vmem_limit),
    )(x_p, eps_p, w1, b1, wml, bml, w2, b2, w3, b3)

    recon = recon_p[:B, :input_dim].astype(jnp.float32)
    mean = ml_p[:B, :latent_dim].astype(jnp.float32)
    logvar = ml_p[:B, lat_pad:lat_pad + latent_dim].astype(jnp.float32)
    return recon, mean, logvar


def init_params(key, input_dim, hidden_dim, latent_dim):
    ks = jax.random.split(key, 6)
    scale = 0.05
    return {
        "w1": scale * jax.random.normal(ks[0], (input_dim, hidden_dim), jnp.float32),
        "b1": jnp.zeros((1, hidden_dim), jnp.float32),
        "wm": scale * jax.random.normal(ks[1], (hidden_dim, latent_dim), jnp.float32),
        "bm": jnp.zeros((1, latent_dim), jnp.float32),
        "wl": scale * jax.random.normal(ks[2], (hidden_dim, latent_dim), jnp.float32),
        "bl": jnp.zeros((1, latent_dim), jnp.float32),
        "w2": scale * jax.random.normal(ks[3], (latent_dim, hidden_dim), jnp.float32),
        "b2": jnp.zeros((1, hidden_dim), jnp.float32),
        "w3": scale * jax.random.normal(ks[4], (hidden_dim, input_dim), jnp.float32),
        "b3": jnp.zeros((1, input_dim), jnp.float32),
    }


def sfen_reference(x, eps, p, compute_dtype=jnp.bfloat16):
    # Mirrors the kernel's numerics: bf16 matmul inputs / eps stream, f32 accumulation,
    # f32 elementwise.  (The underlying VAE math is unchanged.)
    def mm(a, w):
        return jnp.dot(a.astype(compute_dtype), w.astype(compute_dtype),
                       preferred_element_type=jnp.float32)
    eps = eps.astype(compute_dtype).astype(jnp.float32)
    h = jnp.maximum(mm(x, p["w1"]) + p["b1"], 0.0)
    mean = mm(h, p["wm"]) + p["bm"]
    logvar = mm(h, p["wl"]) + p["bl"]
    z = mean + eps * jnp.exp(0.5 * logvar)
    h2 = jnp.maximum(mm(z, p["w2"]) + p["b2"], 0.0)
    recon = mm(h2, p["w3"]) + p["b3"]
    return recon, mean, logvar


if __name__ == "__main__":
    key = jax.random.PRNGKey(0)
    k_x, k_eps, k_p = jax.random.split(key, 3)

    B, input_dim, hidden_dim, latent_dim = 8, 32, 32, 16
    x = jax.random.normal(k_x, (B, input_dim), jnp.float32)
    eps = jax.random.normal(k_eps, (B, latent_dim), jnp.float32)  # deterministic "randn_like"
    params = init_params(k_p, input_dim, hidden_dim, latent_dim)

    fwd = jax.jit(sfen_forward)
    recon, mean, logvar = fwd(x, eps, params)
    jax.block_until_ready((recon, mean, logvar))

    assert recon.shape == (B, input_dim)
    assert mean.shape == (B, latent_dim) and logvar.shape == (B, latent_dim)

    r_ref, m_ref, lv_ref = sfen_reference(x, eps, params)
    # Outputs are stored as bf16 (HBM-stream optimization), so compare with bf16 slack.
    assert jnp.allclose(recon, r_ref, atol=2e-2, rtol=2e-2)
    assert jnp.allclose(mean, m_ref, atol=2e-2, rtol=2e-2)
    assert jnp.allclose(logvar, lv_ref, atol=2e-2, rtol=2e-2)

    print("KERNEL_OK")
</pallas_src>

<mosaic_0001>
module attributes {stable_mosaic.version = 11 : i64} {
  func.func @sfen_kernel(%arg0: i32, %arg1: memref<16x128xbf16, #tpu.memory_space<vmem>>, %arg2: memref<16x128xbf16, #tpu.memory_space<vmem>>, %arg3: memref<128x128xbf16, #tpu.memory_space<vmem>>, %arg4: memref<1x128xf32, #tpu.memory_space<vmem>>, %arg5: memref<128x256xbf16, #tpu.memory_space<vmem>>, %arg6: memref<1x256xf32, #tpu.memory_space<vmem>>, %arg7: memref<128x128xbf16, #tpu.memory_space<vmem>>, %arg8: memref<1x128xf32, #tpu.memory_space<vmem>>, %arg9: memref<128x128xbf16, #tpu.memory_space<vmem>>, %arg10: memref<1x128xf32, #tpu.memory_space<vmem>>, %arg11: memref<16x128xbf16, #tpu.memory_space<vmem>>, %arg12: memref<16x256xbf16, #tpu.memory_space<vmem>>) attributes {dimension_semantics = [#tpu.dimension_semantics<parallel>], iteration_bounds = array<i64: 1>, scalar_prefetch = 0 : i64, scratch_operands = 0 : i64, tpu.core_type = #tpu.core_type<tc>, window_params = [{transform_indices = @transform_0, window_bounds = array<i64: 16, 128>}, {transform_indices = @transform_1, window_bounds = array<i64: 16, 128>}, {pipeline_mode = #tpu.pipeline_mode<synchronous>, transform_indices = @transform_2, window_bounds = array<i64: 128, 128>}, {pipeline_mode = #tpu.pipeline_mode<synchronous>, transform_indices = @transform_3, window_bounds = array<i64: 1, 128>}, {pipeline_mode = #tpu.pipeline_mode<synchronous>, transform_indices = @transform_4, window_bounds = array<i64: 128, 256>}, {pipeline_mode = #tpu.pipeline_mode<synchronous>, transform_indices = @transform_5, window_bounds = array<i64: 1, 256>}, {pipeline_mode = #tpu.pipeline_mode<synchronous>, transform_indices = @transform_6, window_bounds = array<i64: 128, 128>}, {pipeline_mode = #tpu.pipeline_mode<synchronous>, transform_indices = @transform_7, window_bounds = array<i64: 1, 128>}, {pipeline_mode = #tpu.pipeline_mode<synchronous>, transform_indices = @transform_8, window_bounds = array<i64: 128, 128>}, {pipeline_mode = #tpu.pipeline_mode<synchronous>, transform_indices = @transform_9, window_bounds = array<i64: 1, 128>}, {transform_indices = @transform_10, window_bounds = array<i64: 16, 128>}, {transform_indices = @transform_11, window_bounds = array<i64: 16, 256>}]} {
    %c0 = arith.constant 0 : index
    %c0_0 = arith.constant 0 : index
    %0 = vector.load %arg1[%c0, %c0_0] : memref<16x128xbf16, #tpu.memory_space<vmem>>, vector<16x128xbf16>
    %c0_1 = arith.constant 0 : index
    %c0_2 = arith.constant 0 : index
    %1 = vector.load %arg3[%c0_1, %c0_2] : memref<128x128xbf16, #tpu.memory_space<vmem>>, vector<128x128xbf16>
    %cst = arith.constant dense<0.000000e+00> : vector<16x128xf32>
    %2 = tpu.matmul %0, %1, %cst {dimension_numbers = #tpu.dot_dimension_numbers<[1], [0], [0], [1], [0, 0, 1, 1], [], []>} : vector<16x128xbf16>, vector<128x128xbf16>, vector<16x128xf32> -> vector<16x128xf32>
    %c0_3 = arith.constant 0 : index
    %c0_4 = arith.constant 0 : index
    %3 = vector.load %arg4[%c0_3, %c0_4] : memref<1x128xf32, #tpu.memory_space<vmem>>, vector<1x128xf32>
    %4 = vector.broadcast %3 : vector<1x128xf32> to vector<16x128xf32>
    %5 = arith.addf %2, %4 : vector<16x128xf32>
    %cst_5 = arith.constant 0.000000e+00 : f32
    %6 = vector.broadcast %cst_5 : f32 to vector<16x128xf32>
    %7 = arith.maximumf %5, %6 : vector<16x128xf32>
    %8 = arith.truncf %7 : vector<16x128xf32> to vector<16x128xbf16>
    %c0_6 = arith.constant 0 : index
    %c0_7 = arith.constant 0 : index
    %9 = vector.load %arg5[%c0_6, %c0_7] : memref<128x256xbf16, #tpu.memory_space<vmem>>, vector<128x256xbf16>
    %cst_8 = arith.constant dense<0.000000e+00> : vector<16x256xf32>
    %10 = tpu.matmul %8, %9, %cst_8 {dimension_numbers = #tpu.dot_dimension_numbers<[1], [0], [0], [1], [0, 0, 1, 1], [], []>} : vector<16x128xbf16>, vector<128x256xbf16>, vector<16x256xf32> -> vector<16x256xf32>
    %c0_9 = arith.constant 0 : index
    %c0_10 = arith.constant 0 : index
    %11 = vector.load %arg6[%c0_9, %c0_10] : memref<1x256xf32, #tpu.memory_space<vmem>>, vector<1x256xf32>
    %12 = vector.broadcast %11 : vector<1x256xf32> to vector<16x256xf32>
    %13 = arith.addf %10, %12 : vector<16x256xf32>
    %14 = vector.extract_strided_slice %13 {offsets = [0, 0], sizes = [16, 128], strides = [1, 1]} : vector<16x256xf32> to vector<16x128xf32>
    %15 = vector.extract_strided_slice %13 {offsets = [0, 128], sizes = [16, 128], strides = [1, 1]} : vector<16x256xf32> to vector<16x128xf32>
    %c0_11 = arith.constant 0 : index
    %c0_12 = arith.constant 0 : index
    %16 = vector.load %arg2[%c0_11, %c0_12] : memref<16x128xbf16, #tpu.memory_space<vmem>>, vector<16x128xbf16>
    %17 = arith.extf %16 : vector<16x128xbf16> to vector<16x128xf32>
    %cst_13 = arith.constant 5.000000e-01 : f32
    %18 = vector.broadcast %cst_13 : f32 to vector<16x128xf32>
    %19 = arith.mulf %18, %15 : vector<16x128xf32>
    %20 = math.exp %19 : vector<16x128xf32>
    %21 = arith.mulf %17, %20 : vector<16x128xf32>
    %22 = arith.addf %14, %21 : vector<16x128xf32>
    %23 = arith.truncf %22 : vector<16x128xf32> to vector<16x128xbf16>
    %c0_14 = arith.constant 0 : index
    %c0_15 = arith.constant 0 : index
    %24 = vector.load %arg7[%c0_14, %c0_15] : memref<128x128xbf16, #tpu.memory_space<vmem>>, vector<128x128xbf16>
    %cst_16 = arith.constant dense<0.000000e+00> : vector<16x128xf32>
    %25 = tpu.matmul %23, %24, %cst_16 {dimension_numbers = #tpu.dot_dimension_numbers<[1], [0], [0], [1], [0, 0, 1, 1], [], []>} : vector<16x128xbf16>, vector<128x128xbf16>, vector<16x128xf32> -> vector<16x128xf32>
    %c0_17 = arith.constant 0 : index
    %c0_18 = arith.constant 0 : index
    %26 = vector.load %arg8[%c0_17, %c0_18] : memref<1x128xf32, #tpu.memory_space<vmem>>, vector<1x128xf32>
    %27 = vector.broadcast %26 : vector<1x128xf32> to vector<16x128xf32>
    %28 = arith.addf %25, %27 : vector<16x128xf32>
    %cst_19 = arith.constant 0.000000e+00 : f32
    %29 = vector.broadcast %cst_19 : f32 to vector<16x128xf32>
    %30 = arith.maximumf %28, %29 : vector<16x128xf32>
    %31 = arith.truncf %30 : vector<16x128xf32> to vector<16x128xbf16>
    %c0_20 = arith.constant 0 : index
    %c0_21 = arith.constant 0 : index
    %32 = vector.load %arg9[%c0_20, %c0_21] : memref<128x128xbf16, #tpu.memory_space<vmem>>, vector<128x128xbf16>
    %cst_22 = arith.constant dense<0.000000e+00> : vector<16x128xf32>
    %33 = tpu.matmul %31, %32, %cst_22 {dimension_numbers = #tpu.dot_dimension_numbers<[1], [0], [0], [1], [0, 0, 1, 1], [], []>} : vector<16x128xbf16>, vector<128x128xbf16>, vector<16x128xf32> -> vector<16x128xf32>
    %c0_23 = arith.constant 0 : index
    %c0_24 = arith.constant 0 : index
    %34 = vector.load %arg10[%c0_23, %c0_24] : memref<1x128xf32, #tpu.memory_space<vmem>>, vector<1x128xf32>
    %35 = vector.broadcast %34 : vector<1x128xf32> to vector<16x128xf32>
    %36 = arith.addf %33, %35 : vector<16x128xf32>
    %37 = arith.truncf %36 : vector<16x128xf32> to vector<16x128xbf16>
    %c0_25 = arith.constant 0 : index
    %c0_26 = arith.constant 0 : index
    %38 = vector.load %arg11[%c0_25, %c0_26] : memref<16x128xbf16, #tpu.memory_space<vmem>>, vector<16x128xbf16>
    tpu.vector_store %arg11[%c0_25, %c0_26], %37 {strides = array<i32>} : memref<16x128xbf16, #tpu.memory_space<vmem>>, vector<16x128xbf16>,
    %39 = arith.truncf %13 : vector<16x256xf32> to vector<16x256xbf16>
    %c0_27 = arith.constant 0 : index
    %c0_28 = arith.constant 0 : index
    %40 = vector.load %arg12[%c0_27, %c0_28] : memref<16x256xbf16, #tpu.memory_space<vmem>>, vector<16x256xbf16>
    tpu.vector_store %arg12[%c0_27, %c0_28], %39 {strides = array<i32>} : memref<16x256xbf16, #tpu.memory_space<vmem>>, vector<16x256xbf16>,
    return
  }
  func.func @transform_0(%arg0: i32) -> (i32, i32) {
    %c0_i32 = arith.constant 0 : i32
    %c0_i32_0 = arith.constant 0 : i32
    return %arg0, %c0_i32 : i32, i32
  }
  func.func @transform_1(%arg0: i32) -> (i32, i32) {
    %c0_i32 = arith.constant 0 : i32
    %c0_i32_0 = arith.constant 0 : i32
    return %arg0, %c0_i32 : i32, i32
  }
  func.func @transform_2(%arg0: i32) -> (i32, i32) {
    %c0_i32 = arith.constant 0 : i32
    %c0_i32_0 = arith.constant 0 : i32
    %c0_i32_1 = arith.constant 0 : i32
    return %c0_i32, %c0_i32_0 : i32, i32
  }
  func.func @transform_3(%arg0: i32) -> (i32, i32) {
    %c0_i32 = arith.constant 0 : i32
    %c0_i32_0 = arith.constant 0 : i32
    %c0_i32_1 = arith.constant 0 : i32
    return %c0_i32, %c0_i32_0 : i32, i32
  }
  func.func @transform_4(%arg0: i32) -> (i32, i32) {
    %c0_i32 = arith.constant 0 : i32
    %c0_i32_0 = arith.constant 0 : i32
    %c0_i32_1 = arith.constant 0 : i32
    return %c0_i32, %c0_i32_0 : i32, i32
  }
  func.func @transform_5(%arg0: i32) -> (i32, i32) {
    %c0_i32 = arith.constant 0 : i32
    %c0_i32_0 = arith.constant 0 : i32
    %c0_i32_1 = arith.constant 0 : i32
    return %c0_i32, %c0_i32_0 : i32, i32
  }
  func.func @transform_6(%arg0: i32) -> (i32, i32) {
    %c0_i32 = arith.constant 0 : i32
    %c0_i32_0 = arith.constant 0 : i32
    %c0_i32_1 = arith.constant 0 : i32
    return %c0_i32, %c0_i32_0 : i32, i32
  }
  func.func @transform_7(%arg0: i32) -> (i32, i32) {
    %c0_i32 = arith.constant 0 : i32
    %c0_i32_0 = arith.constant 0 : i32
    %c0_i32_1 = arith.constant 0 : i32
    return %c0_i32, %c0_i32_0 : i32, i32
  }
  func.func @transform_8(%arg0: i32) -> (i32, i32) {
    %c0_i32 = arith.constant 0 : i32
    %c0_i32_0 = arith.constant 0 : i32
    %c0_i32_1 = arith.constant 0 : i32
    return %c0_i32, %c0_i32_0 : i32, i32
  }
  func.func @transform_9(%arg0: i32) -> (i32, i32) {
    %c0_i32 = arith.constant 0 : i32
    %c0_i32_0 = arith.constant 0 : i32
    %c0_i32_1 = arith.constant 0 : i32
    return %c0_i32, %c0_i32_0 : i32, i32
  }
  func.func @transform_10(%arg0: i32) -> (i32, i32) {
    %c0_i32 = arith.constant 0 : i32
    %c0_i32_0 = arith.constant 0 : i32
    return %arg0, %c0_i32 : i32, i32
  }
  func.func @transform_11(%arg0: i32) -> (i32, i32) {
    %c0_i32 = arith.constant 0 : i32
    %c0_i32_0 = arith.constant 0 : i32
    return %arg0, %c0_i32 : i32, i32
  }
}

</mosaic_0001>

<bundles_post_ra>
// kernel: sfen_forward.1
= control target key start
LH: loop header
LB: loop body
LE: loop exit
PB: predicated region body
PF: predicated region fallthrough
CT: control target
= control target key end

     0   :  { %v790_v0 = vmov 0.0   ;;  %vm791_vm0 = vmmov 0   ;;  %v792_v26 = vmov 0   ;;  %v179_v51 = vlaneseq  ;;  %s1030_s2 = inlined_call_operand.vmem [shape: bf16[128,128], index: 2, kind: input, shape index: {}]   ;;  %s1031_s4 = inlined_call_operand.vmem [shape: bf16[128,256], index: 4, kind: input, shape index: {}]   ;;  %s1032_s0 = inlined_call_operand.vmem [shape: bf16[16,128], index: 0, kind: input, shape index: {}]   ;;  %s1033_s6 = inlined_call_operand.vmem [shape: bf16[128,128], index: 6, kind: input, shape index: {}]   ;;  %s1034_s3 = inlined_call_operand.vmem [shape: f32[1,128], index: 3, kind: input, shape index: {}]   ;;  %s1035_s8 = inlined_call_operand.vmem [shape: bf16[128,128], index: 8, kind: input, shape index: {}]   ;;  %s1036_s5 = inlined_call_operand.vmem [shape: f32[1,256], index: 5, kind: input, shape index: {}]   ;;  %s1037_s11 = inlined_call_operand.vmem [shape: bf16[16,256], index: 11, kind: output, shape index: {1}]   ;;  %s1038_s1 = inlined_call_operand.vmem [shape: bf16[16,128], index: 1, kind: input, shape index: {}]   ;;  %s1039_s7 = inlined_call_operand.vmem [shape: f32[1,128], index: 7, kind: input, shape index: {}]   ;;  %s1040_s9 = inlined_call_operand.vmem [shape: f32[1,128], index: 9, kind: input, shape index: {}]   ;;  %s1041_s10 = inlined_call_operand.vmem [shape: bf16[16,128], index: 10, kind: output, shape index: {0}]  }
   0x1   :  { %674 = vmatprep.subr.bf16.mxu0 %v790_v0  ;;  %v737_v1 = vld [vmem:[%s1030_s2] sm:$0xff]   ;;  %690 = vmatprep.mubr.msk.bf16.mxu0 %vm791_vm0, %v790_v0  ;;  %v738_v2 = vld [vmem:[%s1030_s2 + $0x8] sm:$0xff]   ;;  %v739_v3 = vld [vmem:[%s1030_s2 + $0x10] sm:$0xff]  }
   0x2   :  { %675 = vmatpush3.bf16.msra.mxu0 %v737_v1  ;;  %v740_v4 = vld [vmem:[%s1030_s2 + $0x18] sm:$0xff]   ;;  %v746_v5 = vld [vmem:[%s1031_s4 + $0x4] ss:$8 sps:$4 sm:$0xff]   ;;  %v748_v6 = vld [vmem:[%s1031_s4] ss:$8 sps:$4 sm:$0xff]   ;;  %301 = vmatprep.mubr.bf16.mxu1 %v792_v26  ;;  %v180_v52 = vshrl.u32 %v179_v51, 7 }
   0x3   :  { %676 = vmatprep.subr.bf16.mxu0 %v790_v0  ;;  %269 = vmatprep.subr.bf16.mxu1 %v746_v5  ;;  %v749_v7 = vld [vmem:[%s1031_s4 + $0x14] ss:$8 sps:$4 sm:$0xff]   ;;  %v751_v8 = vld [vmem:[%s1031_s4 + $0x10] ss:$8 sps:$4 sm:$0xff]   ;;  %v752_v9 = vld [vmem:[%s1031_s4 + $0x24] ss:$8 sps:$4 sm:$0xff]  }
   0x4   :  { %270 = vmatpush1.bf16.msra.mxu1 %v748_v6  ;;  %v741_v10 = vld [vmem:[%s1030_s2 + $0x20] sm:$0xff]   ;;  %v755_v12 = vld [vmem:[%s1031_s4 + $0x34] ss:$8 sps:$4 sm:$0xff]   ;;  %v742_v13 = vld [vmem:[%s1030_s2 + $0x28] sm:$0xff]   ;;  %v181_v53 = vsub.s32 0, %v180_v52  ;;  %v185_v55 = vsub.s32 1, %v180_v52 }
   0x5   :  { %271 = vmatprep.subr.bf16.mxu1 %v749_v7  ;;  %v754_v11 = vld [vmem:[%s1031_s4 + $0x20] ss:$8 sps:$4 sm:$0xff]   ;;  %v757_v14 = vld [vmem:[%s1031_s4 + $0x30] ss:$8 sps:$4 sm:$0xff]   ;;  %v758_v15 = vld [vmem:[%s1031_s4 + $0x44] ss:$8 sps:$4 sm:$0xff]  }
   0x6   :  { %677 = vmatpush3.bf16.msra.mxu0 %v738_v2  ;;  %v743_v16 = vld [vmem:[%s1030_s2 + $0x30] sm:$0xff]   ;;  %v760_v17 = vld [vmem:[%s1031_s4 + $0x40] ss:$8 sps:$4 sm:$0xff]   ;;  %v744_v19 = vld [vmem:[%s1030_s2 + $0x38] sm:$0xff]  }
   0x7   :  { %678 = vmatprep.subr.bf16.mxu0 %v790_v0  ;;  %v761_v18 = vld [vmem:[%s1031_s4 + $0x54] ss:$8 sps:$4 sm:$0xff]   ;;  %v763_v20 = vld [vmem:[%s1031_s4 + $0x50] ss:$8 sps:$4 sm:$0xff]   ;;  %v745_v21 = vld [vmem:[%s1032_s0] sm:$0xff]  }
   0x8   :  { %272 = vmatpush1.bf16.msra.mxu1 %v751_v8  ;;  %v764_v22 = vld [vmem:[%s1031_s4 + $0x64] ss:$8 sps:$4 sm:$0xff]   ;;  %v766_v23 = vld [vmem:[%s1031_s4 + $0x60] ss:$8 sps:$4 sm:$0xff]   ;;  %v767_v24 = vld [vmem:[%s1031_s4 + $0x74] ss:$8 sps:$4 sm:$0xff]  }
   0x9   :  { %273 = vmatprep.subr.bf16.mxu1 %v752_v9  ;;  %v769_v25 = vld [vmem:[%s1031_s4 + $0x70] ss:$8 sps:$4 sm:$0xff]   ;;  %v770_v27 = vld [vmem:[%s1033_s6] sm:$0xff]   ;;  %v771_v38 = vld [vmem:[%s1033_s6 + $0x8] sm:$0xff]  }
   0xa   :  { %679 = vmatpush3.bf16.msra.mxu0 %v739_v3  ;;  %v586_v28 = vld [vmem:[%s1034_s3] ss:$0 sm:$0xff]  ;;  %v772_v39 = vld [vmem:[%s1033_s6 + $0x10] sm:$0xff]   ;;  %v773_v40 = vld [vmem:[%s1033_s6 + $0x18] sm:$0xff]  }
   0xb   :  { %680 = vmatprep.subr.bf16.mxu0 %v790_v0  ;;  %v774_v41 = vld [vmem:[%s1033_s6 + $0x20] sm:$0xff]   ;;  %v775_v42 = vld [vmem:[%s1033_s6 + $0x28] sm:$0xff]   ;;  %v776_v43 = vld [vmem:[%s1033_s6 + $0x30] sm:$0xff]  }
   0xc   :  { %274 = vmatpush1.bf16.msra.mxu1 %v754_v11  ;;  %v777_v44 = vld [vmem:[%s1033_s6 + $0x38] sm:$0xff]   ;;  %v778_v45 = vld [vmem:[%s1035_s8] sm:$0xff]   ;;  %v779_v46 = vld [vmem:[%s1035_s8 + $0x8] sm:$0xff]  }
   0xd   :  { %275 = vmatprep.subr.bf16.mxu1 %v755_v12  ;;  %v780_v47 = vld [vmem:[%s1035_s8 + $0x10] sm:$0xff]   ;;  %v781_v48 = vld [vmem:[%s1035_s8 + $0x18] sm:$0xff]   ;;  %v782_v49 = vld [vmem:[%s1035_s8 + $0x20] sm:$0xff]  }
   0xe   :  { %681 = vmatpush3.bf16.msra.mxu0 %v740_v4  ;;  %v783_v50 = vld [vmem:[%s1035_s8 + $0x28] sm:$0xff]   ;;  %v177_v54 = vld [vmem:[%s1036_s5] sm:$0x3] }
   0xf   :  { %682 = vmatprep.subr.bf16.mxu0 %v790_v0  ;;  %v182_v56 = vrot.slane %v177_v54, %v181_v53  ;;  %v186_v57 = vrot.slane %v177_v54, %v185_v55  ;;  %v639_v9 = vld [vmem:[%s1038_s1] sm:$0xff]  }
  0x10   :  { %276 = vmatpush1.bf16.msra.mxu1 %v757_v14  ;;  %v641_v11 = vunpack.c.h.bf16 %v639_v9 }
  0x11   :  { %277 = vmatprep.subr.bf16.mxu1 %v758_v15 }
  0x12   :  { %683 = vmatpush3.bf16.msra.mxu0 %v741_v10  ;;  %v640_v10 = vunpack.c.l.bf16 %v639_v9 }
  0x13   :  { %684 = vmatprep.subr.bf16.mxu0 %v790_v0 }
  0x14   :  { %278 = vmatpush1.bf16.msra.mxu1 %v760_v17 }
  0x15   :  { %279 = vmatprep.subr.bf16.mxu1 %v761_v18 }
  0x16   :  { %685 = vmatpush3.bf16.msra.mxu0 %v742_v13 }
  0x17   :  { %686 = vmatprep.subr.bf16.mxu0 %v790_v0 }
  0x18   :  { %280 = vmatpush1.bf16.msra.mxu1 %v763_v20  ;;  %v785_v20 = vld [vmem:[%s1035_s8 + $0x38] sm:$0xff]  }
  0x19   :  { %281 = vmatprep.subr.bf16.mxu1 %v764_v22 }
  0x1a   :  { %687 = vmatpush3.bf16.msra.mxu0 %v743_v16 }
  0x1b   :  { %688 = vmatprep.subr.bf16.mxu0 %v790_v0 }
  0x1c   :  { %282 = vmatpush1.bf16.msra.mxu1 %v766_v23 }
  0x1d   :  { %283 = vmatprep.subr.bf16.mxu1 %v767_v24 }
  0x1e   :  { %689 = vmatpush3.bf16.msra.mxu0 %v744_v19  ;;  %v784_v19 = vld [vmem:[%s1035_s8 + $0x30] sm:$0xff]  }
  0x1f   :  { %694 = vmatprep.subr.bf16.mxu0 %v790_v0 }
  0x20   :  { %284 = vmatpush1.bf16.msra.mxu1 %v769_v25 }
  0x21   :  { %691 = vmatmul.mubr.bf16.vlgmr.msra.gmra.mrb[0].mxu0 %v745_v21  ;;  %714 = vmatprep.subr.bf16.mxu1 %v790_v0  ;;  %v612_v21 = vld [vmem:[%s1039_s7] ss:$0 sm:$0xff] }
  0x22   :  { %710 = vmatprep.mubr.msk.bf16.mxu0 %vm791_vm0, %v790_v0  ;;  %695 = vmatpush3.bf16.msra.mxu0 %v770_v27 }
  0x23   :  { %696 = vmatprep.subr.bf16.mxu0 %v790_v0 }
  0x26   :  { %697 = vmatpush3.bf16.msra.mxu0 %v771_v38 }
  0x27   :  { %698 = vmatprep.subr.bf16.mxu0 %v790_v0 }
  0x2a   :  { %699 = vmatpush3.bf16.msra.mxu0 %v772_v39 }
  0x2b   :  { %700 = vmatprep.subr.bf16.mxu0 %v790_v0 }
  0x2e   :  { %701 = vmatpush3.bf16.msra.mxu0 %v773_v40 }
  0x2f   :  { %702 = vmatprep.subr.bf16.mxu0 %v790_v0 }
  0x32   :  { %703 = vmatpush3.bf16.msra.mxu0 %v774_v41 }
  0x33   :  { %704 = vmatprep.subr.bf16.mxu0 %v790_v0 }
  0x36   :  { %705 = vmatpush3.bf16.msra.mxu0 %v775_v42 }
  0x37   :  { %706 = vmatprep.subr.bf16.mxu0 %v790_v0 }
  0x3a   :  { %707 = vmatpush3.bf16.msra.mxu0 %v776_v43 }
  0x3b   :  { %708 = vmatprep.subr.bf16.mxu0 %v790_v0 }
  0x3e   :  { %709 = vmatpush3.bf16.msra.mxu0 %v777_v44 }
  0xf4   :  { %v151_v29 = vpop.f32.mrb[0].mxu0 }
  0xf5   :  { %v152_v30 = vadd.f32 %v586_v28, %v151_v29  ;;  %v692_v31 = vpop.f32.mrb[1].mxu0 }
  0xf6   :  { %v154_v32 = vpop.f32.mrb[2].mxu0 }
  0xf7   :  { %v155_v33 = vadd.f32 %v586_v28, %v154_v32  ;;  %v693_v34 = vpop.f32.mrb[3].mxu0  ;;  %v158_v35 = vmax.f32 %v152_v30, 0.0 }
  0xf9   :  { %v159_v36 = vmax.f32 %v155_v33, 0.0 }
  0xfb   :  { %v160_v37 = vpack.c.bf16 %v159_v36, %v158_v35 }
  0xfd   :  { %302 = vmatmul.mubr.bf16.vlgmr.msra.gmra.mrb[0].mxu1 %v160_v37 }
  0xfe   :  { %730 = vmatprep.mubr.msk.bf16.mxu1 %vm791_vm0, %v790_v0  ;;  %715 = vmatpush3.bf16.msra.mxu1 %v778_v45 }
  0xff   :  { %716 = vmatprep.subr.bf16.mxu1 %v790_v0 }
 0x102   :  { %717 = vmatpush3.bf16.msra.mxu1 %v779_v46 }
 0x103   :  { %718 = vmatprep.subr.bf16.mxu1 %v790_v0 }
 0x106   :  { %719 = vmatpush3.bf16.msra.mxu1 %v780_v47 }
 0x107   :  { %720 = vmatprep.subr.bf16.mxu1 %v790_v0 }
 0x10a   :  { %721 = vmatpush3.bf16.msra.mxu1 %v781_v48 }
 0x10b   :  { %722 = vmatprep.subr.bf16.mxu1 %v790_v0 }
 0x10e   :  { %723 = vmatpush3.bf16.msra.mxu1 %v782_v49 }
 0x10f   :  { %724 = vmatprep.subr.bf16.mxu1 %v790_v0 }
 0x112   :  { %725 = vmatpush3.bf16.msra.mxu1 %v783_v50 }
 0x113   :  { %726 = vmatprep.subr.bf16.mxu1 %v790_v0 }
 0x116   :  { %727 = vmatpush3.bf16.msra.mxu1 %v784_v19 }
 0x117   :  { %728 = vmatprep.subr.bf16.mxu1 %v790_v0  ;;  %v621_v0 = vld [vmem:[%s1040_s9] ss:$0 sm:$0xff] }
 0x11a   :  { %729 = vmatpush3.bf16.msra.mxu1 %v785_v20 }
 0x1d0   :  { %v303_v58 = vpop.f32.mrb[0].mxu1 }
 0x1d1   :  { %v304_v59 = vadd.f32 %v303_v58, %v182_v56  ;;  %v305_v60 = vpop.f32.mrb[1].mxu1 }
 0x1d2   :  { %v306_v61 = vadd.f32 %v305_v60, %v186_v57  ;;  %v307_v62 = vpop.f32.mrb[2].mxu1 }
 0x1d3   :  { %v308_v63 = vadd.f32 %v307_v62, %v182_v56  ;;  %v309_v1 = vpop.f32.mrb[3].mxu1 }
 0x1d4   :  { %v316_v2 = vmul.f32 0.5, %v306_v61  ;;  %v636_v3 = vpack.c.bf16 %v306_v61, %v304_v59  ;;  %v310_v4 = vadd.f32 %v309_v1, %v186_v57 }
 0x1d6   :  { %v318_v5 = vmul.f32 1.442695, %v316_v2  ;;  %576 = vst [vmem:[%s1037_s11] sm:$0xff] %v636_v3  ;;  %v317_v6 = vmul.f32 0.5, %v310_v4  ;;  %v637_v7 = vpack.c.bf16 %v310_v4, %v308_v63 }
 0x1d8   :  { %786 = vpow2.f32 %v318_v5  ;;  %v320_v8 = vmul.f32 1.442695, %v317_v6  ;;  %577 = vst [vmem:[%s1037_s11 + $0x8] sm:$0xff] %v637_v7 }
 0x1da   :  { %788 = vpow2.f32 %v320_v8 }
 0x1e2   :  { %v787_v12 = vpop.eup %786 }
 0x1e3   :  { %v322_v13 = vmul.f32 %v787_v12, %v640_v10 }
 0x1e4   :  { %v789_v14 = vpop.eup %788 }
 0x1e5   :  { %v323_v15 = vmul.f32 %v789_v14, %v641_v11  ;;  %v324_v16 = vadd.f32 %v322_v13, %v304_v59 }
 0x1e7   :  { %v325_v17 = vadd.f32 %v323_v15, %v308_v63 }
 0x1e9   :  { %v326_v18 = vpack.c.bf16 %v325_v17, %v324_v16 }
 0x1eb   :  { %711 = vmatmul.mubr.bf16.vlgmr.msra.gmra.mrb[4].mxu0 %v326_v18 }
 0x2be   :  { %v432_v22 = vpop.f32.mrb[4].mxu0 }
 0x2bf   :  { %v433_v23 = vadd.f32 %v612_v21, %v432_v22  ;;  %v712_v24 = vpop.f32.mrb[5].mxu0 }
 0x2c0   :  { %v435_v25 = vpop.f32.mrb[6].mxu0 }
 0x2c1   :  { %v436_v26 = vadd.f32 %v612_v21, %v435_v25  ;;  %v713_v27 = vpop.f32.mrb[7].mxu0  ;;  %v439_v28 = vmax.f32 %v433_v23, 0.0 }
 0x2c3   :  { %v440_v29 = vmax.f32 %v436_v26, 0.0 }
 0x2c5   :  { %v441_v30 = vpack.c.bf16 %v440_v29, %v439_v28 }
 0x2c7   :  { %731 = vmatmul.mubr.bf16.vlgmr.msra.gmra.mrb[4].mxu1 %v441_v30 }
 0x39a   :  { %v547_v31 = vpop.f32.mrb[4].mxu1 }
 0x39b   :  { %v732_v32 = vpop.f32.mrb[5].mxu1  ;;  %v548_v34 = vadd.f32 %v621_v0, %v547_v31 }
 0x39c   :  { %v550_v33 = vpop.f32.mrb[6].mxu1 }
 0x39d   :  { %v551_v35 = vadd.f32 %v621_v0, %v550_v33  ;;  %v733_v36 = vpop.f32.mrb[7].mxu1 }
 0x39f   :  { %v645_v37 = vpack.c.bf16 %v551_v35, %v548_v34 }
 0x3a1   :  { %646 = vst [vmem:[%s1041_s10] sm:$0xff] %v645_v37  }

</bundles_post_ra>
